<compile_context>
chip_gen: v7x
topology: tpu7x:2x2x1
jax: 0.10.0
libtpu: 0.0.40
codegen_flags: <defaults>
</compile_context>

<pallas_src>
import functools

import jax
import jax.numpy as jnp
from jax import lax
from jax.experimental import pallas as pl
from jax.experimental.pallas import tpu as pltpu


def _ce_multi_kernel(logits_ref, tgt_ref, out_ref, *, scale):
    # logits_ref: (R, C) float32, R = T*N rows (lane-dense along classes)
    # tgt_ref:    (R, 1) int32 class indices
    x = logits_ref[...].astype(jnp.float32)        # (R, C)
    tgt = tgt_ref[...]                             # (R, 1)

    # numerically stable log-sum-exp over the class axis
    m = jnp.max(x, axis=-1, keepdims=True)                               # (R, 1)
    lse = m + jnp.log(jnp.sum(jnp.exp(x - m), axis=-1, keepdims=True))   # (R, 1)

    # gather the target logit via one-hot compare + masked sum (VPU select,
    # XLU reduce) -- no dynamic gather needed, no MXU involvement.
    col_ids = lax.broadcasted_iota(jnp.int32, x.shape, 1)                # (R, C)
    tgt_logit = jnp.sum(jnp.where(col_ids == tgt, x, 0.0),
                        axis=-1, keepdims=True)                          # (R, 1)

    per_row = lse - tgt_logit                                            # (R, 1)

    # mean over batch then mean over pairs == single sum * 1/(T*N); the
    # scale is a trace-time constant so this is one multiply, no divides.
    out_ref[0, 0] = (jnp.sum(per_row) * scale).astype(jnp.float32)


def loss_multi_targets(logits, targets):
    """logits: (T, N, C) float32, targets: (T, N) int32 -> scalar float32."""
    T, N, C = logits.shape
    R = T * N

    # Contiguous (free) reshapes in the wrapper: one lane/sublane-dense slab.
    logits2d = logits.reshape(R, C).astype(jnp.float32)
    targets2d = targets.reshape(R, 1).astype(jnp.int32)

    kernel = functools.partial(_ce_multi_kernel, scale=1.0 / float(R))

    out = pl.pallas_call(
        kernel,
        out_shape=jax.ShapeDtypeStruct((1, 1), jnp.float32),
        grid_spec=pltpu.PrefetchScalarGridSpec(
            num_scalar_prefetch=0,
            grid=(1,),  # single step: whole problem is a few KiB, overhead-bound
            in_specs=[
                pl.BlockSpec((R, C), lambda i: (0, 0)),
                pl.BlockSpec((R, 1), lambda i: (0, 0)),
            ],
            out_specs=pl.BlockSpec(
                (1, 1), lambda i: (0, 0), memory_space=pltpu.SMEM
            ),
        ),
        compiler_params=pltpu.CompilerParams(
            dimension_semantics=("arbitrary",),
        ),
    )(logits2d, targets2d)
    return out[0, 0]


def _reference(logits, targets):
    # Pure-JAX reference mirroring torch.nn.CrossEntropyLoss (mean reduction)
    logp = jax.nn.log_softmax(logits.astype(jnp.float32), axis=-1)  # (T, N, C)
    nll = -jnp.take_along_axis(logp, targets[..., None], axis=-1)[..., 0]  # (T, N)
    per_pair = jnp.mean(nll, axis=-1)  # (T,)
    return jnp.mean(per_pair)


if __name__ == "__main__":
    key = jax.random.PRNGKey(0)
    T, N, C = 3, 8, 32  # 3 (input, target) pairs; batch 8; 32 classes

    k_logits, k_tgt = jax.random.split(key)
    logits = jax.random.normal(k_logits, (T, N, C), dtype=jnp.float32)
    targets = jax.random.randint(k_tgt, (T, N), 0, C, dtype=jnp.int32)

    out = loss_multi_targets(logits, targets)
    out = jax.block_until_ready(out)

    ref = _reference(logits, targets)
    assert jnp.allclose(out, ref, rtol=1e-5, atol=1e-5), (out, ref)

    print("KERNEL_OK")
</pallas_src>

<mosaic_0001>
module attributes {stable_mosaic.version = 11 : i64} {
  func.func @_ce_multi_kernel(%arg0: i32, %arg1: memref<24x32xf32, #tpu.memory_space<vmem>>, %arg2: memref<24x1xi32, #tpu.memory_space<vmem>>, %arg3: memref<1x1xf32, #tpu.memory_space<smem>>) attributes {dimension_semantics = [#tpu.dimension_semantics<arbitrary>], iteration_bounds = array<i64: 1>, scalar_prefetch = 0 : i64, scratch_operands = 0 : i64, tpu.core_type = #tpu.core_type<tc>, window_params = [{pipeline_mode = #tpu.pipeline_mode<synchronous>, transform_indices = @transform_0, window_bounds = array<i64: 24, 32>}, {pipeline_mode = #tpu.pipeline_mode<synchronous>, transform_indices = @transform_1, window_bounds = array<i64: 24, 1>}, {transform_indices = @transform_2, window_bounds = array<i64: 1, 1>}]} {
    %c0 = arith.constant 0 : index
    %c0_0 = arith.constant 0 : index
    %0 = vector.load %arg1[%c0, %c0_0] : memref<24x32xf32, #tpu.memory_space<vmem>>, vector<24x32xf32>
    %c0_1 = arith.constant 0 : index
    %c0_2 = arith.constant 0 : index
    %1 = vector.load %arg2[%c0_1, %c0_2] : memref<24x1xi32, #tpu.memory_space<vmem>>, vector<24x1xi32>
    %cst = arith.constant dense<0xFF800000> : vector<24xf32>
    %2 = vector.multi_reduction <maximumf>, %0, %cst [1] : vector<24x32xf32> to vector<24xf32>
    %3 = vector.shape_cast %2 : vector<24xf32> to vector<24x1xf32>
    %4 = vector.broadcast %3 : vector<24x1xf32> to vector<24x32xf32>
    %5 = arith.subf %0, %4 : vector<24x32xf32>
    %6 = math.exp %5 : vector<24x32xf32>
    %cst_3 = arith.constant dense<0.000000e+00> : vector<24xf32>
    %7 = vector.multi_reduction <add>, %6, %cst_3 [1] : vector<24x32xf32> to vector<24xf32>
    %8 = vector.shape_cast %7 : vector<24xf32> to vector<24x1xf32>
    %9 = math.log %8 : vector<24x1xf32>
    %10 = arith.addf %3, %9 : vector<24x1xf32>
    %11 = tpu.iota {dimensions = array<i32: 1>} : vector<24x32xi32>
    %12 = vector.broadcast %1 : vector<24x1xi32> to vector<24x32xi32>
    %13 = arith.cmpi eq, %11, %12 : vector<24x32xi32>
    %cst_4 = arith.constant 0.000000e+00 : f32
    %14 = vector.broadcast %cst_4 : f32 to vector<24x32xf32>
    %15 = arith.select %13, %0, %14 : vector<24x32xi1>, vector<24x32xf32>
    %cst_5 = arith.constant dense<0.000000e+00> : vector<24xf32>
    %16 = vector.multi_reduction <add>, %15, %cst_5 [1] : vector<24x32xf32> to vector<24xf32>
    %17 = vector.shape_cast %16 : vector<24xf32> to vector<24x1xf32>
    %18 = arith.subf %10, %17 : vector<24x1xf32>
    %19 = vector.shape_cast %18 : vector<24x1xf32> to vector<1x24x1xf32>
    %cst_6 = arith.constant dense<0.000000e+00> : vector<1xf32>
    %20 = vector.multi_reduction <add>, %19, %cst_6 [1, 2] : vector<1x24x1xf32> to vector<1xf32>
    %21 = vector.shape_cast %20 : vector<1xf32> to vector<1x1x1xf32>
    %22 = vector.extract %21[0, 0, 0] : f32 from vector<1x1x1xf32>
    %cst_7 = arith.constant 0.0416666679 : f32
    %23 = arith.mulf %22, %cst_7 : f32
    %c0_8 = arith.constant 0 : index
    %c0_9 = arith.constant 0 : index
    %24 = memref.load %arg3[%c0_8, %c0_9] : memref<1x1xf32, #tpu.memory_space<smem>>
    memref.store %23, %arg3[%c0_8, %c0_9] : memref<1x1xf32, #tpu.memory_space<smem>>
    return
  }
  func.func @transform_0(%arg0: i32) -> (i32, i32) {
    %c0_i32 = arith.constant 0 : i32
    %c0_i32_0 = arith.constant 0 : i32
    %c0_i32_1 = arith.constant 0 : i32
    return %c0_i32, %c0_i32_0 : i32, i32
  }
  func.func @transform_1(%arg0: i32) -> (i32, i32) {
    %c0_i32 = arith.constant 0 : i32
    %c0_i32_0 = arith.constant 0 : i32
    %c0_i32_1 = arith.constant 0 : i32
    return %c0_i32, %c0_i32_0 : i32, i32
  }
  func.func @transform_2(%arg0: i32) -> (i32, i32) {
    %c0_i32 = arith.constant 0 : i32
    %c0_i32_0 = arith.constant 0 : i32
    %c0_i32_1 = arith.constant 0 : i32
    return %c0_i32, %c0_i32_0 : i32, i32
  }
}

</mosaic_0001>

<bundles_post_ra>
// kernel: tpu_custom_call.1
= control target key start
LH: loop header
LB: loop body
LE: loop exit
PB: predicated region body
PF: predicated region fallthrough
CT: control target
= control target key end

     0   :  { %vm18_vm0 = vcmask 261120   ;;  %v145_v5 = vmov 0   ;;  %s201_s0 = inlined_call_operand.vmem [shape: f32[24,32], index: 0, kind: input, shape index: {}]   ;;  %s202_s1 = inlined_call_operand.vmem [shape: s32[24,1], index: 1, kind: input, shape index: {}]   ;;  %s203_s2 = inlined_call_operand.hbm [shape: f32[1,1], index: 2, kind: output, shape index: {}]  }
   0x1   :  { %v12_v0 = vld [vmem:[%s201_s0] sm:$0xff]  ;;  %v14_v1 = vld [vmem:[%s201_s0 + $0x10] sm:$0xff]  ;;  %v13_v2 = vld [vmem:[%s201_s0 + $0x8] sm:$0xff]  ;;  %119 = vset.pattern.permute.xlu1 %v145_v5  ;;  %120 = vset.pattern.permute.xlu0 %v145_v5 }
   0x2   :  { %v19_v3 = vsel %vm18_vm0, %v12_v0, -inf  ;;  %v25_v4 = vsel %vm18_vm0, %v14_v1, -inf }
   0x3   :  { %20 = vmax.xlane.f32.xlu0 %v19_v3  ;;  %26 = vmax.xlane.f32.xlu1 %v25_v4 }
   0x4   :  { %7 = vsyncpa [#allocation3], 0  ;;  %v22_v6 = vsel %vm18_vm0, %v13_v2, -inf  ;;  %v15_v7 = vld [vmem:[%s202_s1] sm:$0xff]  ;;  %v17_v8 = vld [vmem:[%s202_s1 + $0x10] sm:$0xff]  ;;  %v55_v19 = vlaneseq  ;;  %vm84_vm4 = vcmask 7168  }
   0x5   :  { %v16_v9 = vld [vmem:[%s202_s1 + $0x8] sm:$0xff]  ;;  %s133_s23 = scalar_lea.hbm %s203_s2, 16 }
   0x6   :  { %v56_v20 = vand.u32 127, %v55_v19  ;;  %p134_p0 = scmp.ne.s32.totalorder %s203_s2, %s133_s23  ;;  %p137_p1 = scmp.lt.u32.totalorder %s133_s23, %s203_s2 }
   0x7   :  { %23 = vmax.xlane.f32.xlu0 %v22_v6 }
   0x8   :  { %p139_p2 = pnand %p137_p1, %p134_p0 }
  0x14   :  { %58 = vperm.xlu1 %119, %v15_v7  }
  0x18   :  { %64 = vperm.xlu1 %119, %v17_v8  }
  0x1d   :  { %61 = vperm.xlu0 %120, %v16_v9  }
  0x90   :  { %v21_v10 = vpop.xlane.xlu0 %20  ;;  %v27_v11 = vpop.xlane.xlu1 %26 }
  0x91   :  { %v28_v12 = vsub.f32 %v12_v0, %v21_v10  ;;  %v30_v13 = vsub.f32 %v14_v1, %v27_v11 }
  0x93   :  { %v31_v14 = vmul.f32 1.442695, %v28_v12  ;;  %v35_v15 = vmul.f32 1.442695, %v30_v13 }
  0x94   :  { %v24_v16 = vpop.xlane.xlu0 %23  ;;  %v59_v21 = vpop.permute.xlu1 %58 }
  0x95   :  { %121 = vpow2.f32 %v31_v14  ;;  %v29_v17 = vsub.f32 %v13_v2, %v24_v16  ;;  %vm66_vm1 = vcmp.eq.s32.totalorder %v56_v20, %v59_v21 }
  0x96   :  { %123 = vpow2.f32 %v35_v15  ;;  %v69_v28 = vsel %vm66_vm1, %v12_v0, 0.0 }
  0x97   :  { %v33_v18 = vmul.f32 1.442695, %v29_v17  ;;  %v72_v30 = vsel %vm18_vm0, %v69_v28, 0.0 }
  0x98   :  { %v65_v31 = vpop.permute.xlu1 %64 }
  0x99   :  { %125 = vpow2.f32 %v33_v18  ;;  %vm68_vm3 = vcmp.eq.s32.totalorder %v56_v20, %v65_v31 }
  0x9a   :  { %v71_v34 = vsel %vm68_vm3, %v14_v1, 0.0 }
  0x9b   :  { %v78_v35 = vsel %vm18_vm0, %v71_v34, 0.0 }
  0x9c   :  { %v62_v25 = vpop.permute.xlu0 %61 }
  0x9d   :  { %vm67_vm2 = vcmp.eq.s32.totalorder %v56_v20, %v62_v25 }
  0x9e   :  { %v70_v32 = vsel %vm67_vm2, %v13_v2, 0.0 }
  0x9f   :  { %v122_v22 = vpop.eup %121  ;;  %v75_v33 = vsel %vm18_vm0, %v70_v32, 0.0 }
  0xa0   :  { %v124_v23 = vpop.eup %123  ;;  %v37_v24 = vsel %vm18_vm0, %v122_v22, 0.0 }
  0xa1   :  { %38 = vadd.xlane.f32.xlu1 %v37_v24  ;;  %v43_v26 = vsel %vm18_vm0, %v124_v23, 0.0 }
  0xa3   :  { %v126_v27 = vpop.eup %125 }
  0xa4   :  { %v40_v29 = vsel %vm18_vm0, %v126_v27, 0.0 }
  0xa5   :  { %44 = vadd.xlane.f32.xlu1 %v43_v26  ;;  %41 = vadd.xlane.f32.xlu0 %v40_v29 }
  0xa9   :  { %73 = vadd.xlane.f32.xlu1 %v72_v30 }
  0xad   :  { %76 = vadd.xlane.f32.xlu1 %v75_v33 }
  0xb1   :  { %79 = vadd.xlane.f32.xlu1 %v78_v35 }
 0x12e   :  { %v39_v36 = vpop.xlane.xlu1 %38 }
 0x12f   :  { %127 = vlog2.f32 %v39_v36 }
 0x132   :  { %v45_v37 = vpop.xlane.xlu1 %44  ;;  %v42_v38 = vpop.xlane.xlu0 %41 }
 0x133   :  { %129 = vlog2.f32 %v45_v37 }
 0x134   :  { %131 = vlog2.f32 %v42_v38 }
 0x136   :  { %v74_v39 = vpop.xlane.xlu1 %73 }
 0x139   :  { %v128_v40 = vpop.eup %127 }
 0x13a   :  { %v47_v41 = vmul.f32 0.6931472, %v128_v40  ;;  %v77_v42 = vpop.xlane.xlu1 %76 }
 0x13c   :  { %v52_v44 = vadd.f32 %v47_v41, %v21_v10 }
 0x13d   :  { %v130_v43 = vpop.eup %129 }
 0x13e   :  { %v132_v45 = vpop.eup %131  ;;  %v51_v46 = vmul.f32 0.6931472, %v130_v43  ;;  %v81_v49 = vsub.f32 %v52_v44, %v74_v39  ;;  %v80_v51 = vpop.xlane.xlu1 %79 }
 0x13f   :  { %v49_v47 = vmul.f32 0.6931472, %v132_v45 }
 0x140   :  { %v54_v48 = vadd.f32 %v51_v46, %v27_v11  ;;  %v85_v54 = vsel %vm84_vm4, %v81_v49, 0.0 }
 0x141   :  { %v53_v50 = vadd.f32 %v49_v47, %v24_v16 }
 0x142   :  { %v83_v53 = vsub.f32 %v54_v48, %v80_v51 }
 0x143   :  { %v82_v52 = vsub.f32 %v53_v50, %v77_v42 }
 0x144   :  { %v88_v57 = vsel %vm84_vm4, %v83_v53, 0.0 }
 0x145   :  { %v86_v55 = vsel %vm84_vm4, %v82_v52, 0.0 }
 0x146   :  { %v87_v56 = vadd.f32 %v86_v55, %v85_v54 }
 0x148   :  { %v89_v58 = vadd.f32 %v88_v57, %v87_v56 }
 0x14a   :  { %90 = vadd.xlane.f32.xlu1 %v89_v58 }
 0x1d7   :  { %v91_v59 = vpop.xlane.xlu1 %90 }
 0x1d8   :  { %v92_v60 = vrot.slane %v91_v59, 4 }
 0x1da   :  { %v93_v61 = vadd.f32 %v92_v60, %v91_v59 }
 0x1dc   :  { %v94_v62 = vrot.slane %v93_v61, 2 }
 0x1de   :  { %v95_v63 = vadd.f32 %v94_v62, %v93_v61 }
 0x1e0   :  { %v96_v0 = vrot.slane %v95_v63, 1 }
 0x1e2   :  { %v97_v1 = vadd.f32 %v96_v0, %v95_v63 }
 0x1e4   :  { %115 = vpush %v97_v1 }
 0x215   :  { %s116_s1 = spop %115 }
 0x216   :  { %s99_s20 = smul.f32 0.041666668, %s116_s1 }
 0x218   :  { %101 = sst [smem:[#allocation2]] %s99_s20 }
 0x219   :  { %142 = shalt.err (!%p139_p2)
}
 0x21a   :  { %s146_s28 = smov [#allocation2]  }
 0x21b   :  { %109 = dma.smem_to_hbm %s146_s28, 16, %s203_s2, [#allocation3]  }
 0x21c   :  { %143 = dma.done.wait [#allocation3], 16  }
 0x21d   :  { %144 = vsyncadd [#allocation3], 4294967280 }
 0x21e   :  { %113 = sfence }
 0x21f   :  { %114 = vsyncpa [#allocation3], 1 }

</bundles_post_ra>
